<compile_context>
chip_gen: v5e
topology: v5e:2x2
jax: 0.10.0
libtpu: 0.0.40
codegen_flags: <defaults>
</compile_context>

<pallas_src>
import functools

import jax
import jax.numpy as jnp
from jax.experimental import pallas as pl
from jax.experimental.pallas import tpu as pltpu


# --------------------------------------------------------------------- pass 1
def _scatter_mlp_kernel(eps,
                        batch_ref, x_ref, xres_ref,
                        wpre_ref, bpre_ref, gg_ref, wgv_ref, wpost_ref,
                        bpost_ref, scale_ref,
                        seg_ref, out_ref):
    t = pl.program_id(0)
    B, W = seg_ref.shape

    # ---- init the pooled accumulator with the residual on the first tile ----
    @pl.when(t == 0)
    def _():
        seg_ref[...] = xres_ref[...]

    # ---- scatter-sum this node tile: one-hot [B, tile_n] @ x [tile_n, W] ----
    ids = batch_ref[...]                                           # [1, tile_n] int32
    rows = jax.lax.broadcasted_iota(jnp.int32, (B, ids.shape[1]), 0)
    onehot = (ids == rows).astype(jnp.bfloat16)                    # 0/1 exact in bf16
    seg_ref[...] += jnp.dot(onehot, x_ref[...],                    # x already bf16
                            preferred_element_type=jnp.float32)

    # ---- on the last tile, run GatedLinearBlock + ScaleLayer -----------------
    @pl.when(t == pl.num_programs(0) - 1)
    def _():
        seg = seg_ref[...]                                         # [B, W] f32

        # pre: Conv1d(W, W, 1) == dense + bias (bf16 MXU, f32 accumulation)
        h = jnp.dot(seg.astype(jnp.bfloat16), wpre_ref[...],
                    preferred_element_type=jnp.float32) + bpre_ref[...]

        # GroupNorm(num_head, W, affine=False): two-pass group stats (stable).
        # GG = (G @ G.T) / group_size broadcasts each group's mean to its channels.
        mean = jnp.dot(h, gg_ref[...], preferred_element_type=jnp.float32)
        c = h - mean
        var = jnp.dot(c * c, gg_ref[...], preferred_element_type=jnp.float32)
        hn = c * jax.lax.rsqrt(var + eps)                          # [B, W]

        # gate|value: single fused matmul against concatenated [W, 2*W*S] weight
        gv = jnp.dot(hn.astype(jnp.bfloat16), wgv_ref[...],
                     preferred_element_type=jnp.float32)           # [B, 2*W*S]
        ws = gv.shape[1] // 2
        prod = jnp.maximum(gv[:, :ws], 0.0) * gv[:, ws:]           # relu(gate) * value

        # post: Conv1d(W*S, W, 1) == dense + bias; then ScaleLayer (exp(scale)*x)
        o = jnp.dot(prod.astype(jnp.bfloat16), wpost_ref[...],
                    preferred_element_type=jnp.float32) + bpost_ref[...]
        out_ref[...] = (o * scale_ref[...]).astype(out_ref.dtype)


# --------------------------------------------------------------------- pass 2
def _gather_kernel(n_graphs, ids_ref, out_ref, msg_ref):
    # Vectorized row gather msg[n] = out[batch[n]] for the whole node tile:
    # a B-way compare-and-select against the per-node graph ids (f32-exact,
    # pure VPU), then one full-width [tile_n, W] lane-dense store.
    ids = ids_ref[...]                                  # [tile_n, 1] int32
    out = out_ref[...]                                  # [B_pad, W]  f32 (resident)
    acc = jnp.zeros(msg_ref.shape, jnp.float32)
    for b in range(n_graphs):                           # static, small B
        acc = jnp.where(ids == b, out[b][None, :], acc)
    msg_ref[...] = acc.astype(msg_ref.dtype)            # padded nodes (-1) -> 0


# -------------------------------------------------------------------- wrapper
def virt_message(x, x_res, batch, batch_size, params, num_head, *, tile_n=512):
    """x: [N, W] f32, x_res: [B, W] f32, batch: [N] int32 in [0, B)."""
    N, W = x.shape
    B = batch_size
    WS = params["w_post_t"].shape[0]            # W * width_scale
    eps = 1e-5

    B_pad = ((max(B, 1) + 15) // 16) * 16       # 16: full bf16 sublane packing
    nt = max(1, pl.cdiv(N, tile_n))
    N_pad = nt * tile_n                         # lane/tile-align the node axis

    # ---- pad / pack operands (bf16 for MXU operands, f32 elsewhere) ---------
    x_p = jnp.zeros((N_pad, W), jnp.bfloat16).at[:N].set(x.astype(jnp.bfloat16))
    xres_p = jnp.zeros((B_pad, W), jnp.float32).at[:B].set(x_res.astype(jnp.float32))
    batch_p = jnp.full((N_pad,), -1, jnp.int32).at[:N].set(batch.astype(jnp.int32))
    batch_row = batch_p.reshape(1, N_pad)       # lane-major ids for the scatter
    batch_col = batch_p.reshape(N_pad, 1)       # sublane-major ids for the gather

    w_pre = params["w_pre_t"].astype(jnp.bfloat16)                               # [W, W]
    w_gv = jnp.concatenate([params["w_gate_dense"], params["w_val_dense"]],
                           axis=1).astype(jnp.bfloat16)                          # [W, 2*W*S]
    w_post = params["w_post_t"].astype(jnp.bfloat16)                             # [W*S, W]
    b_pre = params["b_pre"].reshape(1, W).astype(jnp.float32)
    b_post = params["b_post"].reshape(1, W).astype(jnp.float32)
    scale = jnp.exp(params["log_scale"]).reshape(1, W).astype(jnp.float32)

    # GG = (G @ G.T) / group_size folds GroupNorm group means into one matmul.
    gsz = W // num_head
    ch = jnp.arange(W) // gsz
    gg = (ch[:, None] == ch[None, :]).astype(jnp.float32) / float(gsz)           # [W, W]

    def resident(shape):
        # Constant-index resident operand: fetched once, single-buffered.
        ndim = len(shape)
        return pl.BlockSpec(shape, lambda *_: (0,) * ndim,
                            pipeline_mode=pl.Buffered(1))

    # ---- pass 1: tiled scatter-sum + GatedLinearBlock + ScaleLayer ----------
    flops = (2 * N_pad * B_pad * W                # scatter
             + 2 * B_pad * W * W                  # pre
             + 2 * (2 * B_pad) * W * W            # groupnorm stats (mean + var)
             + 2 * B_pad * W * (2 * WS)           # gate|value
             + 2 * B_pad * WS * W)                # post
    bytes1 = (2 * N_pad * W + 4 * N_pad           # x (bf16) + batch ids
              + 4 * B_pad * W * 3                 # x_res + seg + out
              + 2 * (W * W + W * 2 * WS + WS * W) # bf16 weights
              + 4 * W * W + 3 * 4 * W)            # GG + biases + scale
    seg, out = pl.pallas_call(
        functools.partial(_scatter_mlp_kernel, eps),
        grid=(nt,),
        in_specs=[
            pl.BlockSpec((1, tile_n), lambda i: (0, i)),     # batch ids (node tile)
            pl.BlockSpec((tile_n, W), lambda i: (i, 0)),     # x (node tile)
            resident((B_pad, W)),                            # x_res
            resident((W, W)), resident((1, W)),              # w_pre, b_pre
            resident((W, W)),                                # GG
            resident((W, 2 * WS)), resident((WS, W)),        # w_gate|val, w_post
            resident((1, W)), resident((1, W)),              # b_post, scale
        ],
        out_specs=(pl.BlockSpec((B_pad, W), lambda i: (0, 0)),   # seg accumulator
                   pl.BlockSpec((B_pad, W), lambda i: (0, 0))),  # out (MLP result)
        out_shape=(jax.ShapeDtypeStruct((B_pad, W), jnp.float32),
                   jax.ShapeDtypeStruct((B_pad, W), jnp.float32)),
        compiler_params=pltpu.CompilerParams(
            dimension_semantics=("arbitrary",),              # seg accumulates across tiles
            vmem_limit_bytes=32 * 1024 * 1024),              # >= 32 MiB (v5e default is 16)
        cost_estimate=pl.CostEstimate(flops=flops, transcendentals=B_pad * W,
                                      bytes_accessed=bytes1),
    )(batch_row, x_p, xres_p, w_pre, b_pre, gg, w_gv, w_post, b_post, scale)

    # ---- pass 2: vectorized row gather msg = out[batch] ----------------------
    msg = pl.pallas_call(
        functools.partial(_gather_kernel, B),
        grid=(nt,),
        in_specs=[
            pl.BlockSpec((tile_n, 1), lambda i: (i, 0)),     # per-node graph ids
            resident((B_pad, W)),                            # out (resident, small)
        ],
        out_specs=pl.BlockSpec((tile_n, W), lambda i: (i, 0)),
        out_shape=jax.ShapeDtypeStruct((N_pad, W), jnp.float32),
        compiler_params=pltpu.CompilerParams(
            dimension_semantics=("parallel",),               # node tiles shard across TCs
            vmem_limit_bytes=32 * 1024 * 1024),
        cost_estimate=pl.CostEstimate(
            flops=2 * B * N_pad * W, transcendentals=0,
            bytes_accessed=4 * (N_pad * W + B_pad * W + N_pad)),
    )(batch_col, out)

    return msg[:N], seg[:B]


# ----------------------------- parameter setup (plain JAX glue) ---------------
def _block_diag_dense(w_groups):
    """w_groups: [H, out_g, in_g] grouped-conv weight -> dense [H*in_g, H*out_g]."""
    H, og, ig = w_groups.shape
    dense = jnp.zeros((H * ig, H * og), jnp.float32)
    for g in range(H):
        dense = dense.at[g * ig:(g + 1) * ig, g * og:(g + 1) * og].set(w_groups[g].T)
    return dense


def init_params(key, width, width_head, width_scale, scale_init=0.01):
    W, H, S = width, width_head, width_scale
    ks = jax.random.split(key, 6)
    w_pre = jax.random.normal(ks[0], (W, W), jnp.float32) * 0.1          # [out, in]
    b_pre = jax.random.normal(ks[1], (W,), jnp.float32) * 0.01
    w_gate_g = jax.random.normal(ks[2], (H, W * S // H, W // H), jnp.float32) * 0.1
    w_val_g = jax.random.normal(ks[3], (H, W * S // H, W // H), jnp.float32) * 0.1
    w_post = jax.random.normal(ks[4], (W, W * S), jnp.float32) * 0.1     # [out, in]
    b_post = jax.random.normal(ks[5], (W,), jnp.float32) * 0.01
    log_scale = jnp.full((W,), jnp.log(scale_init), jnp.float32)
    return {
        "w_pre_t": w_pre.T, "b_pre": b_pre,
        "w_gate_g": w_gate_g, "w_val_g": w_val_g,
        "w_gate_dense": _block_diag_dense(w_gate_g),
        "w_val_dense": _block_diag_dense(w_val_g),
        "w_post_t": w_post.T, "b_post": b_post,
        "log_scale": log_scale,
        "w_pre": w_pre, "w_post": w_post,
    }


def reference(x, x_res, batch, batch_size, params, num_head):
    """Pure-JAX f32 reference mirroring the PyTorch module (eval mode)."""
    W = x.shape[1]
    H = num_head
    seg = jnp.zeros((batch_size, W), jnp.float32).at[batch].add(x) + x_res
    h = seg @ params["w_pre"].T + params["b_pre"]
    hg = h.reshape(batch_size, H, W // H)
    mean = hg.mean(-1, keepdims=True)
    var = ((hg - mean) ** 2).mean(-1, keepdims=True)
    hn = ((hg - mean) / jnp.sqrt(var + 1e-5))
    gate = jax.nn.relu(jnp.einsum("bhk,hok->bho", hn, params["w_gate_g"]))
    val = jnp.einsum("bhk,hok->bho", hn, params["w_val_g"])
    prod = (gate * val).reshape(batch_size, -1)
    out = prod @ params["w_post"].T + params["b_post"]
    out = out * jnp.exp(params["log_scale"])
    return out[batch], seg


if __name__ == "__main__":
    width, width_head, width_scale = 128, 4, 2
    batch_size, num_nodes = 8, 16

    key = jax.random.PRNGKey(0)
    k_x, k_res, k_b, k_p = jax.random.split(key, 4)
    x = jax.random.normal(k_x, (num_nodes, width), jnp.float32)
    x_res = jax.random.normal(k_res, (batch_size, width), jnp.float32)
    batch = jnp.sort(jax.random.randint(k_b, (num_nodes,), 0, batch_size, jnp.int32))
    params = init_params(k_p, width, width_head, width_scale)

    msg, xres_new = virt_message(x, x_res, batch, batch_size, params, width_head)
    jax.block_until_ready((msg, xres_new))

    msg_ref, xres_ref = reference(x, x_res, batch, batch_size, params, width_head)
    # bf16 MXU operands (f32 accumulation) -> relaxed tolerance vs f32 reference.
    assert jnp.allclose(xres_new, xres_ref, rtol=1e-2, atol=2e-2), "x_res mismatch"
    assert jnp.allclose(msg, msg_ref, rtol=5e-2, atol=5e-3), "msg mismatch"

    print("KERNEL_OK")
</pallas_src>

<mosaic_0001>
module attributes {stable_mosaic.version = 11 : i64} {
  func.func @_scatter_mlp_kernel(%arg0: i32, %arg1: memref<1x512xi32, #tpu.memory_space<vmem>>, %arg2: memref<512x128xbf16, #tpu.memory_space<vmem>>, %arg3: memref<16x128xf32, #tpu.memory_space<vmem>>, %arg4: memref<128x128xbf16, #tpu.memory_space<vmem>>, %arg5: memref<1x128xf32, #tpu.memory_space<vmem>>, %arg6: memref<128x128xf32, #tpu.memory_space<vmem>>, %arg7: memref<128x512xbf16, #tpu.memory_space<vmem>>, %arg8: memref<256x128xbf16, #tpu.memory_space<vmem>>, %arg9: memref<1x128xf32, #tpu.memory_space<vmem>>, %arg10: memref<1x128xf32, #tpu.memory_space<vmem>>, %arg11: memref<16x128xf32, #tpu.memory_space<vmem>>, %arg12: memref<16x128xf32, #tpu.memory_space<vmem>>) attributes {dimension_semantics = [#tpu.dimension_semantics<arbitrary>], iteration_bounds = array<i64: 1>, scalar_prefetch = 0 : i64, scratch_operands = 0 : i64, tpu.core_type = #tpu.core_type<tc>, window_params = [{transform_indices = @transform_0, window_bounds = array<i64: 1, 512>}, {transform_indices = @transform_1, window_bounds = array<i64: 512, 128>}, {pipeline_mode = #tpu.pipeline_mode<synchronous>, transform_indices = @transform_2, window_bounds = array<i64: 16, 128>}, {pipeline_mode = #tpu.pipeline_mode<synchronous>, transform_indices = @transform_3, window_bounds = array<i64: 128, 128>}, {pipeline_mode = #tpu.pipeline_mode<synchronous>, transform_indices = @transform_4, window_bounds = array<i64: 1, 128>}, {pipeline_mode = #tpu.pipeline_mode<synchronous>, transform_indices = @transform_5, window_bounds = array<i64: 128, 128>}, {pipeline_mode = #tpu.pipeline_mode<synchronous>, transform_indices = @transform_6, window_bounds = array<i64: 128, 512>}, {pipeline_mode = #tpu.pipeline_mode<synchronous>, transform_indices = @transform_7, window_bounds = array<i64: 256, 128>}, {pipeline_mode = #tpu.pipeline_mode<synchronous>, transform_indices = @transform_8, window_bounds = array<i64: 1, 128>}, {pipeline_mode = #tpu.pipeline_mode<synchronous>, transform_indices = @transform_9, window_bounds = array<i64: 1, 128>}, {pipeline_mode = #tpu.pipeline_mode<synchronous>, transform_indices = @transform_10, window_bounds = array<i64: 16, 128>}, {pipeline_mode = #tpu.pipeline_mode<synchronous>, transform_indices = @transform_11, window_bounds = array<i64: 16, 128>}]} {
    %c0_i32 = arith.constant 0 : i32
    %0 = arith.cmpi eq, %arg0, %c0_i32 : i32
    %1 = arith.extui %0 : i1 to i32
    %c0_i32_0 = arith.constant 0 : i32
    %2 = arith.cmpi ne, %1, %c0_i32_0 : i32
    scf.if %2 {
      %c0_10 = arith.constant 0 : index
      %c0_11 = arith.constant 0 : index
      %18 = vector.load %arg3[%c0_10, %c0_11] : memref<16x128xf32, #tpu.memory_space<vmem>>, vector<16x128xf32>
      %c0_12 = arith.constant 0 : index
      %c0_13 = arith.constant 0 : index
      %19 = vector.load %arg11[%c0_12, %c0_13] : memref<16x128xf32, #tpu.memory_space<vmem>>, vector<16x128xf32>
      tpu.vector_store %arg11[%c0_12, %c0_13], %18 {strides = array<i32>} : memref<16x128xf32, #tpu.memory_space<vmem>>, vector<16x128xf32>,
    } else {
    }
    %c0 = arith.constant 0 : index
    %c0_1 = arith.constant 0 : index
    %3 = vector.load %arg1[%c0, %c0_1] : memref<1x512xi32, #tpu.memory_space<vmem>>, vector<1x512xi32>
    %4 = tpu.iota {dimensions = array<i32: 0>} : vector<16x512xi32>
    %5 = vector.broadcast %3 : vector<1x512xi32> to vector<16x512xi32>
    %6 = arith.cmpi eq, %5, %4 : vector<16x512xi32>
    %7 = arith.extui %6 : vector<16x512xi1> to vector<16x512xi32>
    %8 = arith.sitofp %7 : vector<16x512xi32> to vector<16x512xf32>
    %9 = arith.truncf %8 : vector<16x512xf32> to vector<16x512xbf16>
    %c0_2 = arith.constant 0 : index
    %c0_3 = arith.constant 0 : index
    %10 = vector.load %arg11[%c0_2, %c0_3] : memref<16x128xf32, #tpu.memory_space<vmem>>, vector<16x128xf32>
    %c0_4 = arith.constant 0 : index
    %c0_5 = arith.constant 0 : index
    %11 = vector.load %arg2[%c0_4, %c0_5] : memref<512x128xbf16, #tpu.memory_space<vmem>>, vector<512x128xbf16>
    %cst = arith.constant dense<0.000000e+00> : vector<16x128xf32>
    %12 = tpu.matmul %9, %11, %cst {dimension_numbers = #tpu.dot_dimension_numbers<[1], [0], [0], [1], [0, 0, 1, 1], [], []>} : vector<16x512xbf16>, vector<512x128xbf16>, vector<16x128xf32> -> vector<16x128xf32>
    %13 = arith.addf %10, %12 : vector<16x128xf32>
    %c0_6 = arith.constant 0 : index
    %c0_7 = arith.constant 0 : index
    %14 = vector.load %arg11[%c0_6, %c0_7] : memref<16x128xf32, #tpu.memory_space<vmem>>, vector<16x128xf32>
    tpu.vector_store %arg11[%c0_6, %c0_7], %13 {strides = array<i32>} : memref<16x128xf32, #tpu.memory_space<vmem>>, vector<16x128xf32>,
    %c0_i32_8 = arith.constant 0 : i32
    %15 = arith.cmpi eq, %arg0, %c0_i32_8 : i32
    %16 = arith.extui %15 : i1 to i32
    %c0_i32_9 = arith.constant 0 : i32
    %17 = arith.cmpi ne, %16, %c0_i32_9 : i32
    scf.if %17 {
      %c0_10 = arith.constant 0 : index
      %c0_11 = arith.constant 0 : index
      %18 = vector.load %arg11[%c0_10, %c0_11] : memref<16x128xf32, #tpu.memory_space<vmem>>, vector<16x128xf32>
      %19 = arith.truncf %18 : vector<16x128xf32> to vector<16x128xbf16>
      %c0_12 = arith.constant 0 : index
      %c0_13 = arith.constant 0 : index
      %20 = vector.load %arg4[%c0_12, %c0_13] : memref<128x128xbf16, #tpu.memory_space<vmem>>, vector<128x128xbf16>
      %cst_14 = arith.constant dense<0.000000e+00> : vector<16x128xf32>
      %21 = tpu.matmul %19, %20, %cst_14 {dimension_numbers = #tpu.dot_dimension_numbers<[1], [0], [0], [1], [0, 0, 1, 1], [], []>} : vector<16x128xbf16>, vector<128x128xbf16>, vector<16x128xf32> -> vector<16x128xf32>
      %c0_15 = arith.constant 0 : index
      %c0_16 = arith.constant 0 : index
      %22 = vector.load %arg5[%c0_15, %c0_16] : memref<1x128xf32, #tpu.memory_space<vmem>>, vector<1x128xf32>
      %23 = vector.broadcast %22 : vector<1x128xf32> to vector<16x128xf32>
      %24 = arith.addf %21, %23 : vector<16x128xf32>
      %c0_17 = arith.constant 0 : index
      %c0_18 = arith.constant 0 : index
      %25 = vector.load %arg6[%c0_17, %c0_18] : memref<128x128xf32, #tpu.memory_space<vmem>>, vector<128x128xf32>
      %cst_19 = arith.constant dense<0.000000e+00> : vector<16x128xf32>
      %26 = tpu.matmul %24, %25, %cst_19 {dimension_numbers = #tpu.dot_dimension_numbers<[1], [0], [0], [1], [0, 0, 1, 1], [], []>} : vector<16x128xf32>, vector<128x128xf32>, vector<16x128xf32> -> vector<16x128xf32>
      %27 = arith.subf %24, %26 : vector<16x128xf32>
      %28 = arith.mulf %27, %27 : vector<16x128xf32>
      %c0_20 = arith.constant 0 : index
      %c0_21 = arith.constant 0 : index
      %29 = vector.load %arg6[%c0_20, %c0_21] : memref<128x128xf32, #tpu.memory_space<vmem>>, vector<128x128xf32>
      %cst_22 = arith.constant dense<0.000000e+00> : vector<16x128xf32>
      %30 = tpu.matmul %28, %29, %cst_22 {dimension_numbers = #tpu.dot_dimension_numbers<[1], [0], [0], [1], [0, 0, 1, 1], [], []>} : vector<16x128xf32>, vector<128x128xf32>, vector<16x128xf32> -> vector<16x128xf32>
      %cst_23 = arith.constant 9.99999974E-6 : f32
      %31 = vector.broadcast %cst_23 : f32 to vector<16x128xf32>
      %32 = arith.addf %30, %31 : vector<16x128xf32>
      %33 = math.rsqrt %32 : vector<16x128xf32>
      %34 = arith.mulf %27, %33 : vector<16x128xf32>
      %35 = arith.truncf %34 : vector<16x128xf32> to vector<16x128xbf16>
      %c0_24 = arith.constant 0 : index
      %c0_25 = arith.constant 0 : index
      %36 = vector.load %arg7[%c0_24, %c0_25] : memref<128x512xbf16, #tpu.memory_space<vmem>>, vector<128x512xbf16>
      %cst_26 = arith.constant dense<0.000000e+00> : vector<16x512xf32>
      %37 = tpu.matmul %35, %36, %cst_26 {dimension_numbers = #tpu.dot_dimension_numbers<[1], [0], [0], [1], [0, 0, 1, 1], [], []>} : vector<16x128xbf16>, vector<128x512xbf16>, vector<16x512xf32> -> vector<16x512xf32>
      %38 = vector.extract_strided_slice %37 {offsets = [0, 0], sizes = [16, 256], strides = [1, 1]} : vector<16x512xf32> to vector<16x256xf32>
      %cst_27 = arith.constant 0.000000e+00 : f32
      %39 = vector.broadcast %cst_27 : f32 to vector<16x256xf32>
      %40 = arith.maximumf %38, %39 : vector<16x256xf32>
      %41 = vector.extract_strided_slice %37 {offsets = [0, 256], sizes = [16, 256], strides = [1, 1]} : vector<16x512xf32> to vector<16x256xf32>
      %42 = arith.mulf %40, %41 : vector<16x256xf32>
      %43 = arith.truncf %42 : vector<16x256xf32> to vector<16x256xbf16>
      %c0_28 = arith.constant 0 : index
      %c0_29 = arith.constant 0 : index
      %44 = vector.load %arg8[%c0_28, %c0_29] : memref<256x128xbf16, #tpu.memory_space<vmem>>, vector<256x128xbf16>
      %cst_30 = arith.constant dense<0.000000e+00> : vector<16x128xf32>
      %45 = tpu.matmul %43, %44, %cst_30 {dimension_numbers = #tpu.dot_dimension_numbers<[1], [0], [0], [1], [0, 0, 1, 1], [], []>} : vector<16x256xbf16>, vector<256x128xbf16>, vector<16x128xf32> -> vector<16x128xf32>
      %c0_31 = arith.constant 0 : index
      %c0_32 = arith.constant 0 : index
      %46 = vector.load %arg9[%c0_31, %c0_32] : memref<1x128xf32, #tpu.memory_space<vmem>>, vector<1x128xf32>
      %47 = vector.broadcast %46 : vector<1x128xf32> to vector<16x128xf32>
      %48 = arith.addf %45, %47 : vector<16x128xf32>
      %c0_33 = arith.constant 0 : index
      %c0_34 = arith.constant 0 : index
      %49 = vector.load %arg10[%c0_33, %c0_34] : memref<1x128xf32, #tpu.memory_space<vmem>>, vector<1x128xf32>
      %50 = vector.broadcast %49 : vector<1x128xf32> to vector<16x128xf32>
      %51 = arith.mulf %48, %50 : vector<16x128xf32>
      %c0_35 = arith.constant 0 : index
      %c0_36 = arith.constant 0 : index
      %52 = vector.load %arg12[%c0_35, %c0_36] : memref<16x128xf32, #tpu.memory_space<vmem>>, vector<16x128xf32>
      tpu.vector_store %arg12[%c0_35, %c0_36], %51 {strides = array<i32>} : memref<16x128xf32, #tpu.memory_space<vmem>>, vector<16x128xf32>,
    } else {
    }
    return
  }
  func.func @transform_0(%arg0: i32) -> (i32, i32) {
    %c0_i32 = arith.constant 0 : i32
    %c0_i32_0 = arith.constant 0 : i32
    return %c0_i32, %arg0 : i32, i32
  }
  func.func @transform_1(%arg0: i32) -> (i32, i32) {
    %c0_i32 = arith.constant 0 : i32
    %c0_i32_0 = arith.constant 0 : i32
    return %arg0, %c0_i32 : i32, i32
  }
  func.func @transform_2(%arg0: i32) -> (i32, i32) {
    %c0_i32 = arith.constant 0 : i32
    %c0_i32_0 = arith.constant 0 : i32
    %c0_i32_1 = arith.constant 0 : i32
    return %c0_i32, %c0_i32_0 : i32, i32
  }
  func.func @transform_3(%arg0: i32) -> (i32, i32) {
    %c0_i32 = arith.constant 0 : i32
    %c0_i32_0 = arith.constant 0 : i32
    %c0_i32_1 = arith.constant 0 : i32
    return %c0_i32, %c0_i32_0 : i32, i32
  }
  func.func @transform_4(%arg0: i32) -> (i32, i32) {
    %c0_i32 = arith.constant 0 : i32
    %c0_i32_0 = arith.constant 0 : i32
    %c0_i32_1 = arith.constant 0 : i32
    return %c0_i32, %c0_i32_0 : i32, i32
  }
  func.func @transform_5(%arg0: i32) -> (i32, i32) {
    %c0_i32 = arith.constant 0 : i32
    %c0_i32_0 = arith.constant 0 : i32
    %c0_i32_1 = arith.constant 0 : i32
    return %c0_i32, %c0_i32_0 : i32, i32
  }
  func.func @transform_6(%arg0: i32) -> (i32, i32) {
    %c0_i32 = arith.constant 0 : i32
    %c0_i32_0 = arith.constant 0 : i32
    %c0_i32_1 = arith.constant 0 : i32
    return %c0_i32, %c0_i32_0 : i32, i32
  }
  func.func @transform_7(%arg0: i32) -> (i32, i32) {
    %c0_i32 = arith.constant 0 : i32
    %c0_i32_0 = arith.constant 0 : i32
    %c0_i32_1 = arith.constant 0 : i32
    return %c0_i32, %c0_i32_0 : i32, i32
  }
  func.func @transform_8(%arg0: i32) -> (i32, i32) {
    %c0_i32 = arith.constant 0 : i32
    %c0_i32_0 = arith.constant 0 : i32
    %c0_i32_1 = arith.constant 0 : i32
    return %c0_i32, %c0_i32_0 : i32, i32
  }
  func.func @transform_9(%arg0: i32) -> (i32, i32) {
    %c0_i32 = arith.constant 0 : i32
    %c0_i32_0 = arith.constant 0 : i32
    %c0_i32_1 = arith.constant 0 : i32
    return %c0_i32, %c0_i32_0 : i32, i32
  }
  func.func @transform_10(%arg0: i32) -> (i32, i32) {
    %c0_i32 = arith.constant 0 : i32
    %c0_i32_0 = arith.constant 0 : i32
    %c0_i32_1 = arith.constant 0 : i32
    return %c0_i32, %c0_i32_0 : i32, i32
  }
  func.func @transform_11(%arg0: i32) -> (i32, i32) {
    %c0_i32 = arith.constant 0 : i32
    %c0_i32_0 = arith.constant 0 : i32
    %c0_i32_1 = arith.constant 0 : i32
    return %c0_i32, %c0_i32_0 : i32, i32
  }
}

</mosaic_0001>

<bundles_post_ra>
// kernel: tpu_custom_call.1
= control target key start
LH: loop header
LB: loop body
LE: loop exit
PB: predicated region body
PF: predicated region fallthrough
CT: control target
= control target key end

     0   :  { %17 = vsyncpa [#allocation3], 0  ;;  %s2031_s0 = inlined_call_operand.hbm [shape: s32[1,512], index: 0, kind: input, shape index: {}]   ;;  %s2032_s1 = inlined_call_operand.hbm [shape: bf16[512,128], index: 1, kind: input, shape index: {}]   ;;  %s2033_s2 = inlined_call_operand.hbm [shape: f32[16,128], index: 2, kind: input, shape index: {}]   ;;  %s2034_s3 = inlined_call_operand.hbm [shape: bf16[128,128], index: 3, kind: input, shape index: {}]   ;;  %s2035_s4 = inlined_call_operand.vmem [shape: f32[1,128], index: 4, kind: input, shape index: {}]   ;;  %s2036_s5 = inlined_call_operand.hbm [shape: f32[128,128], index: 5, kind: input, shape index: {}]   ;;  %s2037_s6 = inlined_call_operand.hbm [shape: bf16[128,512], index: 6, kind: input, shape index: {}]   ;;  %s2038_s7 = inlined_call_operand.hbm [shape: bf16[256,128], index: 7, kind: input, shape index: {}]   ;;  %s2039_s8 = inlined_call_operand.vmem [shape: f32[1,128], index: 8, kind: input, shape index: {}]   ;;  %s2040_s9 = inlined_call_operand.vmem [shape: f32[1,128], index: 9, kind: input, shape index: {}]   ;;  %s2041_s10 = inlined_call_operand.hbm [shape: f32[16,128], index: 10, kind: output, shape index: {0}]   ;;  %s2042_s11 = inlined_call_operand.hbm [shape: f32[16,128], index: 11, kind: output, shape index: {1}]  }
   0x1   :  { %18 = vsyncpa [#allocation6], 0 }
   0x2   :  { %19 = vsyncpa [#allocation9], 0 }
   0x3   :  { %20 = vsyncpa [#allocation12], 0 }
   0x4   :  { %21 = vsyncpa [#allocation4], 0  ;;  %s38_s19 = sshll.u32 %s2032_s1, 4  ;;  %s39_s19 = int_to_ptr.hbm [resolvable:$true] %s38_s19 }
   0x5   :  { %22 = vsyncpa [#allocation16], 0  ;;  %s1858_s20 = smov [#allocation5]   ;;  %s64_s24 = sshll.u32 %s2034_s3, 4  ;;  %s65_s24 = int_to_ptr.hbm [resolvable:$true] %s64_s24 }
   0x6   :  { %s40_s21 = sshll.u32 %s1858_s20, 4  ;;  %s1859_s25 = smov 64   ;;  %s41_s21 = int_to_ptr.vmem [resolvable:$true] %s40_s21 }
   0x7   :  { %s1860_s26 = smov 4   ;;  %s1861_s27 = smov [#allocation8]  }
   0x8   :  { %46 = dma.hbm_to_vmem [thread:$0]  %s39_s19, 4096, %s41_s21, [#allocation6], %s1859_s25, %s1859_s25, %s1860_s26  }
   0x9   :  { %s66_s28 = sshll.u32 %s1861_s27, 4  ;;  %s92_s30 = sshll.u32 %s2037_s6, 4  ;;  %s67_s28 = int_to_ptr.vmem [resolvable:$true] %s66_s28  ;;  %s93_s30 = int_to_ptr.hbm [resolvable:$true] %s92_s30 }
   0xa   :  { %72 = dma.hbm_to_vmem [thread:$0]  %s65_s24, 1024, %s67_s28, [#allocation9], %s1859_s25, %s1859_s25, %s1860_s26  }
   0xb   :  { %s1862_s3 = smov [#allocation11]   ;;  %s28_s15 = sshll.u32 %s2031_s0, 4  ;;  %s29_s15 = int_to_ptr.hbm [resolvable:$true] %s28_s15 }
   0xc   :  { %s94_s12 = sshll.u32 %s1862_s3, 4  ;;  %s1863_s16 = smov 256   ;;  %s95_s12 = int_to_ptr.vmem [resolvable:$true] %s94_s12 }
   0xd   :  { %s1864_s17 = smov 16   ;;  %s1865_s18 = smov [#allocation2]  }
   0xe   :  { %100 = dma.hbm_to_vmem [thread:$0]  %s93_s30, 4096, %s95_s12, [#allocation12], %s1863_s16, %s1863_s16, %s1864_s17  }
   0xf   :  { %s30_s19 = sshll.u32 %s1865_s18, 4  ;;  %s51_s21 = sshll.u32 %s2033_s2, 4  ;;  %s31_s19 = int_to_ptr.vmem [resolvable:$true] %s30_s19  ;;  %s52_s21 = int_to_ptr.hbm [resolvable:$true] %s51_s21 }
  0x10   :  { %33 = dma.hbm_to_vmem [thread:$0]  %s29_s15, 64, %s31_s19, [#allocation3]  }
  0x11   :  { %s1866_s22 = smov [#allocation7]   ;;  %s79_s0 = sshll.u32 %s2036_s5, 4  ;;  %s80_s0 = int_to_ptr.hbm [resolvable:$true] %s79_s0 }
  0x12   :  { %s53_s23 = sshll.u32 %s1866_s22, 4  ;;  %s1867_s28 = smov 128   ;;  %s54_s23 = int_to_ptr.vmem [resolvable:$true] %s53_s23 }
  0x13   :  { %s1868_s29 = smov 8   ;;  %s1869_s1 = smov [#allocation10]  }
  0x14   :  { %59 = dma.hbm_to_vmem [thread:$0]  %s52_s21, 256, %s54_s23, [#allocation6], %s1867_s28, %s1867_s28, %s1868_s29  }
  0x15   :  { %s81_s30 = sshll.u32 %s1869_s1, 4  ;;  %s105_s12 = sshll.u32 %s2038_s7, 4  ;;  %s82_s30 = int_to_ptr.vmem [resolvable:$true] %s81_s30  ;;  %s106_s12 = int_to_ptr.hbm [resolvable:$true] %s105_s12 }
  0x16   :  { %87 = dma.hbm_to_vmem [thread:$0]  %s80_s0, 2048, %s82_s30, [#allocation9], %s1867_s28, %s1867_s28, %s1868_s29  }
  0x17   :  { %s1870_s5 = smov [#allocation13]  }
  0x18   :  { %s107_s13 = sshll.u32 %s1870_s5, 4  ;;  %s108_s13 = int_to_ptr.vmem [resolvable:$true] %s107_s13 }
  0x19   :  { %113 = dma.hbm_to_vmem [thread:$0]  %s106_s12, 2048, %s108_s13, [#allocation12], %s1859_s25, %s1859_s25, %s1860_s26  }
  0x1a   :  { %1846 = dma.done.wait [#allocation3], 64  }
  0x1b   :  { %1847 = vsyncadd [#allocation3], 4294967232 }
  0x1c   :  { %1848 = dma.done.wait [#allocation6], 4352  }
  0x1d   :  { %1849 = vsyncadd [#allocation6], 4294962944 }
  0x1e   :  { %1850 = dma.done.wait [#allocation9], 3072  }
  0x1f   :  { %1851 = vsyncadd [#allocation9], 4294964224 }
  0x20   :  { %1852 = dma.done.wait [#allocation12], 6144  }
  0x21   :  { %1853 = vsyncadd [#allocation12], 4294961152  ;;  %v1526_v0 = vld [vmem:[#allocation5 + $0x38] sm:$0xff]  ;;  %v1525_v4 = vld [vmem:[#allocation5 + $0x30] sm:$0xff]  ;;  %v155_v16 = vlaneseq  ;;  %v1871_v45 = vmov 1.0|1.0  }
  0x22   :  { %v1534_v1 = vld [vmem:[#allocation5 + $0x78] sm:$0xff]  ;;  %448 = vmatpush.bf16.msra.mxu0 %v1526_v0  ;;  %v1533_v5 = vld [vmem:[#allocation5 + $0x70] sm:$0xff]  ;;  %v1524_v8 = vld [vmem:[#allocation5 + $0x28] sm:$0xff]  ;;  %s1117_s16 = sshll.u32 %s2041_s10, 4  ;;  %s1873_s10 = smov [#allocation15]   ;;  %s1118_s16 = int_to_ptr.hbm [resolvable:$true] %s1117_s16 }
  0x23   :  { %v1542_v2 = vld [vmem:[#allocation5 + $0xb8] sm:$0xff]  ;;  %462 = vmatpush.bf16.msra.mxu1 %v1534_v1  ;;  %v1541_v6 = vld [vmem:[#allocation5 + $0xb0] sm:$0xff]  ;;  %v1532_v9 = vld [vmem:[#allocation5 + $0x68] sm:$0xff]  ;;  %v156_v21 = vshrl.u32 %v155_v16, 7  ;;  %s1128_s20 = sshll.u32 %s1873_s10, 4  ;;  %s1130_s23 = sshll.u32 %s2042_s11, 4  ;;  %s1129_s20 = int_to_ptr.vmem [resolvable:$true] %s1128_s20  ;;  %s1131_s23 = int_to_ptr.hbm [resolvable:$true] %s1130_s23 }
  0x24   :  { %v1550_v3 = vld [vmem:[#allocation5 + $0xf8] sm:$0xff]  ;;  %476 = vmatpush.bf16.msra.mxu2 %v1542_v2  ;;  %v1549_v7 = vld [vmem:[#allocation5 + $0xf0] sm:$0xff]  ;;  %v1540_v10 = vld [vmem:[#allocation5 + $0xa8] sm:$0xff] }
  0x25   :  { %490 = vmatpush.bf16.msra.mxu3 %v1550_v3  ;;  %v1548_v11 = vld [vmem:[#allocation5 + $0xe8] sm:$0xff]  ;;  %v1523_v12 = vld [vmem:[#allocation5 + $0x20] sm:$0xff]  ;;  %v1522_v17 = vld [vmem:[#allocation5 + $0x18] sm:$0xff]  ;;  %v157_v27 = vadd.s32 8, %v156_v21 }
  0x26   :  { %449 = vmatpush.bf16.msra.mxu0 %v1525_v4  ;;  %v1531_v13 = vld [vmem:[#allocation5 + $0x60] sm:$0xff]  ;;  %v1530_v18 = vld [vmem:[#allocation5 + $0x58] sm:$0xff]  ;;  %v1521_v22 = vld [vmem:[#allocation5 + $0x10] sm:$0xff] }
  0x27   :  { %463 = vmatpush.bf16.msra.mxu1 %v1533_v5  ;;  %v1539_v14 = vld [vmem:[#allocation5 + $0xa0] sm:$0xff]  ;;  %v1538_v19 = vld [vmem:[#allocation5 + $0x98] sm:$0xff]  ;;  %v1529_v23 = vld [vmem:[#allocation5 + $0x50] sm:$0xff] }
  0x28   :  { %477 = vmatpush.bf16.msra.mxu2 %v1541_v6  ;;  %v1547_v15 = vld [vmem:[#allocation5 + $0xe0] sm:$0xff]  ;;  %v1546_v20 = vld [vmem:[#allocation5 + $0xd8] sm:$0xff]  ;;  %v1537_v25 = vld [vmem:[#allocation5 + $0x90] sm:$0xff] }
  0x29   :  { %491 = vmatpush.bf16.msra.mxu3 %v1549_v7  ;;  %v154_v24 = vld [vmem:[#allocation2] sm:$0xf]  ;;  %v1545_v26 = vld [vmem:[#allocation5 + $0xd0] sm:$0xff]  ;;  %v1520_v29 = vld [vmem:[#allocation5 + $0x8] sm:$0xff] }
  0x2a   :  { %450 = vmatpush.bf16.msra.mxu0 %v1524_v8  ;;  %v158_v28 = vperm.slane %v154_v24, 0  ;;  %v1528_v30 = vld [vmem:[#allocation5 + $0x48] sm:$0xff]  ;;  %v159_v31 = vperm.slane %v154_v24, 1  ;;  %v160_v34 = vperm.slane %v154_v24, 2  ;;  %v161_v35 = vperm.slane %v154_v24, 3  ;;  %v1519_v38 = vld [vmem:[#allocation5] sm:$0xff] }
  0x2b   :  { %464 = vmatpush.bf16.msra.mxu1 %v1532_v9  ;;  %v1536_v32 = vld [vmem:[#allocation5 + $0x88] sm:$0xff]  ;;  %v1527_v39 = vld [vmem:[#allocation5 + $0x40] sm:$0xff]  ;;  %v1556_v48 = vld [vmem:[#allocation8 + $0x28] sm:$0xff] }
  0x2c   :  { %478 = vmatpush.bf16.msra.mxu2 %v1540_v10  ;;  %v1544_v33 = vld [vmem:[#allocation5 + $0xc8] sm:$0xff]  ;;  %vm1970_vm0 = vcmp.eq.s32.totalorder %v158_v28, %v156_v21  ;;  %vm1974_vm1 = vcmp.eq.s32.totalorder %v158_v28, %v157_v27  ;;  %vm1978_vm2 = vcmp.eq.s32.totalorder %v159_v31, %v156_v21  ;;  %vm1982_vm3 = vcmp.eq.s32.totalorder %v159_v31, %v157_v27  ;;  %v1535_v42 = vld [vmem:[#allocation5 + $0x80] sm:$0xff]  ;;  %v1555_v49 = vld [vmem:[#allocation8 + $0x20] sm:$0xff] }
  0x2d   :  { %492 = vmatpush.bf16.msra.mxu3 %v1548_v11  ;;  %v1543_v43 = vld [vmem:[#allocation5 + $0xc0] sm:$0xff]  ;;  %vm1986_vm4 = vcmp.eq.s32.totalorder %v160_v34, %v156_v21  ;;  %vm168_vm5 = vcmp.eq.s32.totalorder %v160_v34, %v157_v27  ;;  %vm1287_vm6 = vmpackc.low %vm1974_vm1, %vm1970_vm0  ;;  %vm165_vm7 = vcmp.eq.s32.totalorder %v161_v35, %v156_v21  ;;  %vm169_vm8 = vcmp.eq.s32.totalorder %v161_v35, %v157_v27  ;;  %v1558_v46 = vld [vmem:[#allocation8 + $0x38] sm:$0xff] }
  0x2e   :  { %451 = vmatpush.bf16.msra.mxu0 %v1523_v12  ;;  %vm1289_vm9 = vmpackc.low %vm1982_vm3, %vm1978_vm2  ;;  %v1557_v47 = vld [vmem:[#allocation8 + $0x30] sm:$0xff]  ;;  %v1554_v50 = vld [vmem:[#allocation8 + $0x18] sm:$0xff] }
  0x2f   :  { %465 = vmatpush.bf16.msra.mxu1 %v1531_v13  ;;  %vm1291_vm10 = vmpackc.low %vm168_vm5, %vm1986_vm4  ;;  %v1553_v51 = vld [vmem:[#allocation8 + $0x10] sm:$0xff]  ;;  %v1552_v52 = vld [vmem:[#allocation8 + $0x8] sm:$0xff] }
  0x30   :  { %479 = vmatpush.bf16.msra.mxu2 %v1539_v14  ;;  %vm1293_vm11 = vmpackc.low %vm169_vm8, %vm165_vm7  ;;  %v1551_v53 = vld [vmem:[#allocation8] sm:$0xff]  ;;  %v611_v54 = vld [vmem:[#allocation10 + $0x78] sm:$0xff] }
  0x31   :  { %493 = vmatpush.bf16.msra.mxu3 %v1547_v15  ;;  %v610_v55 = vld [vmem:[#allocation10 + $0x70] sm:$0xff]  ;;  %v609_v56 = vld [vmem:[#allocation10 + $0x68] sm:$0xff]  ;;  %v608_v57 = vld [vmem:[#allocation10 + $0x60] sm:$0xff] }
  0x32   :  { %452 = vmatpush.bf16.msra.mxu0 %v1522_v17  ;;  %v607_v58 = vld [vmem:[#allocation10 + $0x58] sm:$0xff]  ;;  %v606_v59 = vld [vmem:[#allocation10 + $0x50] sm:$0xff]  ;;  %v605_v62 = vld [vmem:[#allocation10 + $0x48] sm:$0xff] }
  0x33   :  { %466 = vmatpush.bf16.msra.mxu1 %v1530_v18  ;;  %v604_v0 = vld [vmem:[#allocation10 + $0x40] sm:$0xff]  ;;  %v603_v1 = vld [vmem:[#allocation10 + $0x38] sm:$0xff]  ;;  %v602_v5 = vld [vmem:[#allocation10 + $0x30] sm:$0xff] }
  0x34   :  { %480 = vmatpush.bf16.msra.mxu2 %v1538_v19  ;;  %v150_v6 = vld [vmem:[#allocation7] sm:$0xff]  ;;  %v601_v8 = vld [vmem:[#allocation10 + $0x28] sm:$0xff]  ;;  %v600_v12 = vld [vmem:[#allocation10 + $0x20] sm:$0xff] }
  0x35   :  { %494 = vmatpush.bf16.msra.mxu3 %v1546_v20  ;;  %v599_v14 = vld [vmem:[#allocation10 + $0x18] sm:$0xff]  ;;  %v598_v17 = vld [vmem:[#allocation10 + $0x10] sm:$0xff]  ;;  %v596_v24 = vld [vmem:[#allocation10] sm:$0xff] }
  0x36   :  { %453 = vmatpush.bf16.msra.mxu0 %v1521_v22  ;;  %v151_v18 = vld [vmem:[#allocation7 + $0x8] sm:$0xff]  ;;  %v1441_v36 = vld [vmem:[#allocation11 + $0xe0] sm:$0xf]  ;;  %v1589_v37 = vld [vmem:[#allocation11 + $0xec] sm:$0xf0] }
  0x37   :  { %467 = vmatpush.bf16.msra.mxu1 %v1529_v23  ;;  %v597_v23 = vld [vmem:[#allocation10 + $0x8] sm:$0xff]  ;;  %v1443_v40 = vld [vmem:[#allocation11 + $0xf0] sm:$0xf0] }
  0x38   :  { %481 = vmatpush.bf16.msra.mxu2 %v1537_v25  ;;  %v1623_v25 = vld [vmem:[%s2035_s4] ss:$0 sm:$0xff]  ;;  %v1449_v41 = vld [vmem:[#allocation11 + $0xe8] sm:$0xf]  ;;  %s1872_s4 = smov [#allocation14]  }
  0x39   :  { %495 = vmatpush.bf16.msra.mxu3 %v1545_v26  ;;  %s1115_s26 = sshll.u32 %s1872_s4, 4  ;;  %s1116_s26 = int_to_ptr.vmem [resolvable:$true] %s1115_s26 }
  0x3a   :  { %454 = vmatpush.bf16.msra.mxu0 %v1520_v29 }
  0x3b   :  { %468 = vmatpush.bf16.msra.mxu1 %v1528_v30 }
  0x3c   :  { %482 = vmatpush.bf16.msra.mxu2 %v1536_v32 }
  0x3d   :  { %496 = vmatpush.bf16.msra.mxu3 %v1544_v33 }
  0x3e   :  { %455 = vmatpush.bf16.msra.mxu0 %v1519_v38  ;;  %v1587_v38 = vld [vmem:[#allocation11 + $0xe4] sm:$0xf] }
  0x3f   :  { %469 = vmatpush.bf16.msra.mxu1 %v1527_v39  ;;  %v1442_v39 = vor.u32 %v1589_v37, %v1441_v36  ;;  %v1567_v36 = vld [vmem:[#allocation11 + $0x44] sm:$0xf] }
  0x40   :  { %483 = vmatpush.bf16.msra.mxu2 %v1535_v42  ;;  %v1590_v42 = vld [vmem:[#allocation11 + $0xf4] sm:$0xf0] }
  0x41   :  { %497 = vmatpush.bf16.msra.mxu3 %v1543_v43  ;;  %1288 = vmatmul.msk.bf16.vlgmr.msra.gmra.mxu0 %vm1287_vm6, %v1871_v45  ;;  %v1446_v43 = vor.u32 %v1587_v38, %v1443_v40  ;;  %v1450_v44 = vor.u32 %v1590_v42, %v1449_v41  ;;  %v1363_v38 = vld [vmem:[#allocation11 + $0x50] sm:$0xf0]  ;;  %v1570_v40 = vld [vmem:[#allocation11 + $0x54] sm:$0xf0] }
  0x42   :  { %1290 = vmatmul.msk.bf16.vlgmr.msra.gmra.mxu1 %vm1289_vm9, %v1871_v45  ;;  %582 = vmatpush.bf16.msrb.mxu0 %v1558_v46  ;;  %v1451_v46 = vld [vmem:[#allocation11 + $0xf8] sm:$0xf0]  ;;  %v1366_v41 = vor.u32 %v1567_v36, %v1363_v38  ;;  %v1595_v36 = vld [vmem:[#allocation13 + $0x20] sm:$0xff] }
  0x43   :  { %1292 = vmatmul.msk.bf16.vlgmr.msra.gmra.mxu2 %vm1291_vm10, %v1871_v45  ;;  %612 = vmatpush.msrb.mxu1 %v611_v54  ;;  %v1594_v38 = vld [vmem:[#allocation13 + $0x18] sm:$0xff] }
  0x44   :  { %1294 = vmatmul.msk.bf16.vlgmr.msra.gmra.mxu3 %vm1293_vm11, %v1871_v45  ;;  %639 = vmatpush.msrb.mxu2 %v611_v54  ;;  %v1588_v45 = vld [vmem:[#allocation11 + $0xec] sm:$0xf]  ;;  %v1586_v54 = vld [vmem:[#allocation11 + $0xd4] sm:$0xf0] }
  0x45   :  { %613 = vmatpush.msrb.mxu1 %v610_v55  ;;  %877 = vmatpush.bf16.msrb.mxu3 %v1442_v39  ;;  %v1369_v39 = vld [vmem:[#allocation11 + $0x48] sm:$0xf] }
  0x46   :  { %583 = vmatpush.bf16.msrb.mxu0 %v1557_v47  ;;  %640 = vmatpush.msrb.mxu2 %v610_v55  ;;  %v1454_v47 = vor.u32 %v1588_v45, %v1451_v46  ;;  %v1370_v42 = vor.u32 %v1570_v40, %v1369_v39  ;;  %v1345_v46 = vld [vmem:[#allocation11 + $0x20] sm:$0xf]  ;;  %v1601_v39 = vld [vmem:[#allocation13 + $0x50] sm:$0xff] }
  0x47   :  { %614 = vmatpush.msrb.mxu1 %v609_v56  ;;  %v1593_v40 = vld [vmem:[#allocation13 + $0x10] sm:$0xff] }
  0x48   :  { %641 = vmatpush.msrb.mxu2 %v609_v56 }
  0x49   :  { %615 = vmatpush.msrb.mxu1 %v608_v57 }
  0x4a   :  { %584 = vmatpush.bf16.msrb.mxu0 %v1556_v48  ;;  %642 = vmatpush.msrb.mxu2 %v608_v57  ;;  %v1425_v48 = vld [vmem:[#allocation11 + $0xc0] sm:$0xf]  ;;  %v1584_v57 = vld [vmem:[#allocation11 + $0xcc] sm:$0xf] }
  0x4b   :  { %616 = vmatpush.msrb.mxu1 %v607_v58 }
  0x4c   :  { %643 = vmatpush.msrb.mxu2 %v607_v58  ;;  %v1435_v58 = vld [vmem:[#allocation11 + $0xd8] sm:$0xf0] }
  0x4d   :  { %617 = vmatpush.msrb.mxu1 %v606_v59 }
  0x4e   :  { %585 = vmatpush.bf16.msrb.mxu0 %v1555_v49  ;;  %644 = vmatpush.msrb.mxu2 %v606_v59  ;;  %v1585_v49 = vld [vmem:[#allocation11 + $0xcc] sm:$0xf0]  ;;  %v1438_v59 = vor.u32 %v1584_v57, %v1435_v58  ;;  %v1329_v58 = vld [vmem:[#allocation11] sm:$0xf] }
  0x4f   :  { %618 = vmatpush.msrb.mxu1 %v605_v62 }
  0x50   :  { %645 = vmatpush.msrb.mxu2 %v605_v62  ;;  %v1579_v62 = vld [vmem:[#allocation11 + $0xa4] sm:$0xf] }
  0x51   :  { %619 = vmatpush.msrb.mxu1 %v604_v0 }
  0x52   :  { %586 = vmatpush.bf16.msrb.mxu0 %v1554_v50  ;;  %646 = vmatpush.msrb.mxu2 %v604_v0  ;;  %v1583_v50 = vld [vmem:[#allocation11 + $0xc4] sm:$0xf]  ;;  %v1411_v0 = vld [vmem:[#allocation11 + $0xb0] sm:$0xf0] }
  0x53   :  { %620 = vmatpush.msrb.mxu1 %v603_v1 }
  0x54   :  { %647 = vmatpush.msrb.mxu2 %v603_v1  ;;  %v1417_v1 = vld [vmem:[#allocation11 + $0xa8] sm:$0xf] }
  0x55   :  { %621 = vmatpush.msrb.mxu1 %v602_v5 }
  0x56   :  { %587 = vmatpush.bf16.msrb.mxu0 %v1553_v51  ;;  %648 = vmatpush.msrb.mxu2 %v602_v5  ;;  %v1426_v51 = vor.u32 %v1585_v49, %v1425_v48  ;;  %v1580_v5 = vld [vmem:[#allocation11 + $0xac] sm:$0xf]  ;;  %v1563_v48 = vld [vmem:[#allocation11 + $0x24] sm:$0xf] }
  0x57   :  { %622 = vmatpush.msrb.mxu1 %v601_v8 }
  0x58   :  { %649 = vmatpush.msrb.mxu2 %v601_v8  ;;  %878 = vmatpush.bf16.msrb.mxu3 %v1426_v51  ;;  %v1393_v8 = vld [vmem:[#allocation11 + $0x80] sm:$0xf]  ;;  %v1353_v51 = vld [vmem:[#allocation11 + $0x28] sm:$0xf] }
  0x59   :  { %623 = vmatpush.msrb.mxu1 %v600_v12 }
  0x5a   :  { %588 = vmatpush.bf16.msrb.mxu0 %v1552_v52  ;;  %650 = vmatpush.msrb.mxu2 %v600_v12  ;;  %v1427_v52 = vld [vmem:[#allocation11 + $0xd0] sm:$0xf0] }
  0x5b   :  { %624 = vmatpush.msrb.mxu1 %v599_v14  ;;  %v1430_v55 = vor.u32 %v1583_v50, %v1427_v52  ;;  %v1395_v12 = vld [vmem:[#allocation11 + $0x90] sm:$0xf0]  ;;  %v1566_v52 = vld [vmem:[#allocation11 + $0x34] sm:$0xf0] }
  0x5c   :  { %651 = vmatpush.msrb.mxu2 %v599_v14  ;;  %v1578_v14 = vld [vmem:[#allocation11 + $0x94] sm:$0xf0]  ;;  %v1347_v50 = vld [vmem:[#allocation11 + $0x30] sm:$0xf0] }
  0x5d   :  { %625 = vmatpush.msrb.mxu1 %v598_v17 }
  0x5e   :  { %589 = vmatpush.bf16.msrb.mxu0 %v1551_v53  ;;  %652 = vmatpush.msrb.mxu2 %v598_v17  ;;  %v1433_v53 = vld [vmem:[#allocation11 + $0xc8] sm:$0xf]  ;;  %v1576_v17 = vld [vmem:[#allocation11 + $0x8c] sm:$0xf] }
  0x5f   :  { %626 = vmatpush.msrb.mxu1 %v597_v23  ;;  %v1434_v56 = vor.u32 %v1586_v54, %v1433_v53  ;;  %v1350_v53 = vor.u32 %v1563_v48, %v1347_v50  ;;  %v1354_v54 = vor.u32 %v1566_v52, %v1353_v51 }
  0x60   :  { %653 = vmatpush.msrb.mxu2 %v597_v23 }
  0x61   :  { %627 = vmatpush.msrb.mxu1 %v596_v24 }
  0x62   :  { %654 = vmatpush.msrb.mxu2 %v596_v24  ;;  %891 = vmatpush.bf16.msra.mxu0 %v1446_v43  ;;  %v1379_v24 = vld [vmem:[#allocation11 + $0x70] sm:$0xf0]  ;;  %v1568_v43 = vld [vmem:[#allocation11 + $0x4c] sm:$0xf] }
  0x63   :  { %905 = vmatpush.bf16.msra.mxu1 %v1450_v44  ;;  %v1371_v44 = vld [vmem:[#allocation11 + $0x58] sm:$0xf0] }
  0x64   :  { %919 = vmatpush.bf16.msra.mxu2 %v1454_v47  ;;  %v1374_v45 = vor.u32 %v1568_v43, %v1371_v44  ;;  %v1565_v47 = vld [vmem:[#allocation11 + $0x2c] sm:$0xf0] }
  0x65   :  { %v1346_v49 = vor.u32 %v1565_v47, %v1345_v46 }
  0x66   :  { %892 = vmatpush.bf16.msra.mxu0 %v1430_v55  ;;  %v1564_v55 = vld [vmem:[#allocation11 + $0x2c] sm:$0xf] }
  0x67   :  { %906 = vmatpush.bf16.msra.mxu1 %v1434_v56  ;;  %v1355_v56 = vld [vmem:[#allocation11 + $0x38] sm:$0xf0] }
  0x68   :  { %920 = vmatpush.bf16.msra.mxu2 %v1438_v59  ;;  %v1358_v57 = vor.u32 %v1564_v55, %v1355_v56  ;;  %v1561_v59 = vld [vmem:[#allocation11 + $0xc] sm:$0xf0] }
  0xbe   :  { %v457_v60 = vpop.f32.mrf.mxu0 }
  0xbf   :  { %v471_v61 = vpop.f32.mrf.mxu1 }
  0xc0   :  { %v472_v63 = vadd.f32 %v471_v61, %v457_v60  ;;  %v1409_v60 = vld [vmem:[#allocation11 + $0xa0] sm:$0xf]  ;;  %v1581_v61 = vld [vmem:[#allocation11 + $0xac] sm:$0xf0] }
  0xc6   :  { %v485_v2 = vpop.f32.mrf.mxu2  ;;  %v459_v9 = vpop.f32.mrf.mxu0 }
  0xc7   :  { %v499_v3 = vpop.f32.mrf.mxu3  ;;  %v486_v4 = vadd.f32 %v485_v2, %v472_v63  ;;  %v473_v10 = vpop.f32.mrf.mxu1  ;;  %v1410_v63 = vor.u32 %v1581_v61, %v1409_v60  ;;  %v1582_v2 = vld [vmem:[#allocation11 + $0xb4] sm:$0xf0]  ;;  %v1559_v60 = vld [vmem:[#allocation11 + $0x4] sm:$0xf]  ;;  %v1330_v61 = vor.u32 %v1561_v59, %v1329_v58 }
  0xc8   :  { %v474_v13 = vadd.f32 %v473_v10, %v459_v9  ;;  %v1577_v9 = vld [vmem:[#allocation11 + $0x8c] sm:$0xf0]  ;;  %v1575_v10 = vld [vmem:[#allocation11 + $0x84] sm:$0xf] }
  0xc9   :  { %v500_v7 = vadd.f32 %v499_v3, %v486_v4  ;;  %v1414_v3 = vor.u32 %v1579_v62, %v1411_v0  ;;  %v1418_v4 = vor.u32 %v1582_v2, %v1417_v1  ;;  %879 = vmatpush.bf16.msrb.mxu3 %v1410_v63  ;;  %v1331_v62 = vld [vmem:[#allocation11 + $0x10] sm:$0xf0]  ;;  %v1337_v63 = vld [vmem:[#allocation11 + $0x8] sm:$0xf]  ;;  %v1562_v0 = vld [vmem:[#allocation11 + $0x14] sm:$0xf0] }
  0xca   :  { %v1334_v1 = vor.u32 %v1559_v60, %v1331_v62  ;;  %v1338_v2 = vor.u32 %v1562_v0, %v1337_v63 }
  0xcb   :  { %v504_v11 = vadd.f32 %v500_v7, %v150_v6  ;;  %v1419_v6 = vld [vmem:[#allocation11 + $0xb8] sm:$0xf0]  ;;  %893 = vmatpush.bf16.msra.mxu0 %v1414_v3  ;;  %907 = vmatpush.bf16.msra.mxu1 %v1418_v4  ;;  %v1560_v3 = vld [vmem:[#allocation11 + $0xc] sm:$0xf] }
  0xcc   :  { %v1422_v7 = vor.u32 %v1580_v5, %v1419_v6  ;;  %v1339_v4 = vld [vmem:[#allocation11 + $0x18] sm:$0xf0] }
  0xcd   :  { %506 = vst [vmem:[#allocation14] sm:$0xff] %v504_v11  ;;  %v1342_v5 = vor.u32 %v1560_v3, %v1339_v4 }
  0xce   :  { %v487_v15 = vpop.f32.mrf.mxu2  ;;  %921 = vmatpush.bf16.msra.mxu2 %v1422_v7 }
  0xcf   :  { %v488_v16 = vadd.f32 %v487_v15, %v474_v13  ;;  %v501_v19 = vpop.f32.mrf.mxu3  ;;  %v1401_v13 = vld [vmem:[#allocation11 + $0x88] sm:$0xf]  ;;  %v1398_v15 = vor.u32 %v1575_v10, %v1395_v12  ;;  %v1605_v10 = vld [vmem:[#allocation13 + $0x70] sm:$0xff] }
  0xd1   :  { %v502_v20 = vadd.f32 %v501_v19, %v488_v16  ;;  %v1402_v16 = vor.u32 %v1578_v14, %v1401_v13  ;;  %894 = vmatpush.bf16.msra.mxu0 %v1398_v15  ;;  %v1604_v13 = vld [vmem:[#allocation13 + $0x68] sm:$0xff] }
  0xd2   :  { %v1596_v14 = vld [vmem:[#allocation13 + $0x28] sm:$0xff] }
  0xd3   :  { %v505_v21 = vadd.f32 %v502_v20, %v151_v18  ;;  %v1403_v18 = vld [vmem:[#allocation11 + $0x98] sm:$0xf0]  ;;  %908 = vmatpush.bf16.msra.mxu1 %v1402_v16  ;;  %v1377_v20 = vld [vmem:[#allocation11 + $0x60] sm:$0xf] }
  0xd4   :  { %v1406_v19 = vor.u32 %v1576_v17, %v1403_v18 }
  0xd5   :  { %507 = vst [vmem:[#allocation14 + $0x8] sm:$0xff] %v505_v21  ;;  %v513_v22 = vpack.c.bf16 %v505_v21, %v504_v11  ;;  %v1394_v11 = vor.u32 %v1577_v9, %v1393_v8  ;;  %v1573_v21 = vld [vmem:[#allocation11 + $0x6c] sm:$0xf0]  ;;  %v1606_v8 = vld [vmem:[#allocation13 + $0x78] sm:$0xff] }
  0xd6   :  { %922 = vmatpush.bf16.msra.mxu2 %v1406_v19  ;;  %v1378_v23 = vor.u32 %v1573_v21, %v1377_v20  ;;  %v1598_v9 = vld [vmem:[#allocation13 + $0x38] sm:$0xff]  ;;  %1123 = dma.vmem_to_hbm [thread:$0]  %s1116_s26, 256, %s1118_s16, [#allocation4], %s1867_s28, %s1867_s28, %s1868_s29  }
  0xd7   :  { %590 = vmatmul.bf16.vlgmr.msrb.gmra.mxu0 %v513_v22  ;;  %880 = vmatpush.bf16.msrb.mxu3 %v1394_v11  ;;  %v1571_v22 = vld [vmem:[#allocation11 + $0x64] sm:$0xf]  ;;  %v1597_v11 = vld [vmem:[#allocation13 + $0x30] sm:$0xff] }
  0xdb   :  { %881 = vmatpush.bf16.msrb.mxu3 %v1378_v23 }
 0x154   :  { %v591_v26 = vpop.f32.mrf.mxu0 }
 0x155   :  { %v592_v27 = vadd.f32 %v1623_v25, %v591_v26  ;;  %v1574_v26 = vld [vmem:[#allocation11 + $0x74] sm:$0xf0] }
 0x157   :  { %628 = vmatmul.f32.vlgmr.msrb.gmra.mxu1 %v592_v27 }
 0x15c   :  { %v593_v28 = vpop.f32.mrf.mxu0 }
 0x15d   :  { %v594_v29 = vadd.f32 %v1623_v25, %v593_v28  ;;  %v1385_v25 = vld [vmem:[#allocation11 + $0x68] sm:$0xf] }
 0x15e   :  { %v1386_v28 = vor.u32 %v1574_v26, %v1385_v25 }
 0x15f   :  { %631 = vmatmul.f32.gmra.mxu1 %v594_v29 }
 0x160   :  { %909 = vmatpush.bf16.msra.mxu1 %v1386_v28 }
 0x164   :  { %910 = vmatpush.bf16.msra.mxu1 %v1370_v42  ;;  %v1591_v42 = vld [vmem:[#allocation13] sm:$0xff] }
 0x168   :  { %911 = vmatpush.bf16.msra.mxu1 %v1354_v54 }
 0x16c   :  { %912 = vmatpush.bf16.msra.mxu1 %v1338_v2 }
 0x1d4   :  { %v629_v30 = vpop.f32.mrf.mxu1 }
 0x1d5   :  { %v2003_v31 = vsub.f32 %v592_v27, %v629_v30  ;;  %v1382_v27 = vor.u32 %v1571_v22, %v1379_v24  ;;  %v1387_v30 = vld [vmem:[#allocation11 + $0x78] sm:$0xf0] }
 0x1d7   :  { %v637_v32 = vmul.f32 %v2003_v31, %v2003_v31  ;;  %895 = vmatpush.bf16.msra.mxu0 %v1382_v27 }
 0x1d9   :  { %655 = vmatmul.f32.vlgmr.msrb.gmra.mxu2 %v637_v32 }
 0x1db   :  { %896 = vmatpush.bf16.msra.mxu0 %v1366_v41  ;;  %v1600_v41 = vld [vmem:[#allocation13 + $0x48] sm:$0xff] }
 0x1dc   :  { %v632_v33 = vpop.f32.mrf.mxu1 }
 0x1dd   :  { %v2007_v34 = vsub.f32 %v594_v29, %v632_v33  ;;  %v1572_v29 = vld [vmem:[#allocation11 + $0x6c] sm:$0xf]  ;;  %v1361_v33 = vld [vmem:[#allocation11 + $0x40] sm:$0xf] }
 0x1de   :  { %v1390_v32 = vor.u32 %v1572_v29, %v1387_v30 }
 0x1df   :  { %v638_v35 = vmul.f32 %v2007_v34, %v2007_v34  ;;  %897 = vmatpush.bf16.msra.mxu0 %v1350_v53 }
 0x1e0   :  { %923 = vmatpush.bf16.msra.mxu2 %v1390_v32 }
 0x1e1   :  { %658 = vmatmul.f32.gmra.mxu2 %v638_v35  ;;  %v1569_v35 = vld [vmem:[#allocation11 + $0x4c] sm:$0xf0] }
 0x1e2   :  { %v1362_v37 = vor.u32 %v1569_v35, %v1361_v33  ;;  %v1603_v35 = vld [vmem:[#allocation13 + $0x60] sm:$0xff] }
 0x1e3   :  { %898 = vmatpush.bf16.msra.mxu0 %v1334_v1  ;;  %v1625_v1 = vld [vmem:[%s2040_s9] ss:$0 sm:$0xff] }
 0x1e4   :  { %882 = vmatpush.bf16.msrb.mxu3 %v1362_v37  ;;  %924 = vmatpush.bf16.msra.mxu2 %v1374_v45  ;;  %v1602_v37 = vld [vmem:[#allocation13 + $0x58] sm:$0xff] }
 0x1e7   :  { %1089 = vmatpush.bf16.msrb.mxu0 %v1606_v8 }
 0x1e8   :  { %883 = vmatpush.bf16.msrb.mxu3 %v1346_v49  ;;  %925 = vmatpush.bf16.msra.mxu2 %v1358_v57 }
 0x1eb   :  { %1090 = vmatpush.bf16.msrb.mxu0 %v1605_v10 }
 0x1ec   :  { %884 = vmatpush.bf16.msrb.mxu3 %v1330_v61  ;;  %926 = vmatpush.bf16.msra.mxu2 %v1342_v5  ;;  %v1624_v61 = vld [vmem:[%s2039_s8] ss:$0 sm:$0xff] }
 0x1ef   :  { %1091 = vmatpush.bf16.msrb.mxu0 %v1604_v13 }
 0x1f0   :  { %1075 = vmatpush.bf16.msra.mxu3 %v1598_v9 }
 0x1f3   :  { %1092 = vmatpush.bf16.msrb.mxu0 %v1603_v35 }
 0x1f4   :  { %1076 = vmatpush.bf16.msra.mxu3 %v1597_v11 }
 0x1f7   :  { %1093 = vmatpush.bf16.msrb.mxu0 %v1602_v37 }
 0x1f8   :  { %1077 = vmatpush.bf16.msra.mxu3 %v1596_v14 }
 0x1fb   :  { %1094 = vmatpush.bf16.msrb.mxu0 %v1601_v39 }
 0x1fc   :  { %1078 = vmatpush.bf16.msra.mxu3 %v1595_v36 }
 0x1ff   :  { %1095 = vmatpush.bf16.msrb.mxu0 %v1600_v41 }
 0x200   :  { %1079 = vmatpush.bf16.msra.mxu3 %v1594_v38 }
 0x204   :  { %1080 = vmatpush.bf16.msra.mxu3 %v1593_v40 }
 0x25c   :  { %v656_v6 = vpop.f32.mrf.mxu2 }
 0x25d   :  { %v657_v7 = vadd.f32 1e-05, %v656_v6 }
 0x25f   :  { %1626 = vrsqrt.f32 %v657_v7  ;;  %vm668_vm13 = vweird.f32 %v657_v7 }
 0x264   :  { %v659_v12 = vpop.f32.mrf.mxu2 }
 0x265   :  { %v1627_v15 = vpop.eup %1626  ;;  %v660_v16 = vadd.f32 1e-05, %v659_v12 }
 0x266   :  { %v663_v17 = vmul.f32 %v1627_v15, %v657_v7  ;;  %vm669_vm12 = vweird.f32 %v1627_v15 }
 0x267   :  { %1628 = vrsqrt.f32 %v660_v16  ;;  %vm670_vm15 = vmor %vm668_vm13, %vm669_vm12  ;;  %vm678_vm0 = vweird.f32 %v660_v16 }
 0x268   :  { %v664_v18 = vmul.f32 %v1627_v15, %v663_v17 }
 0x26a   :  { %v665_v19 = vmul.f32 0.5, %v664_v18 }
 0x26c   :  { %v666_v21 = vsub.f32 1.5, %v665_v19 }
 0x26d   :  { %v1629_v20 = vpop.eup %1628 }
 0x26e   :  { %v673_v22 = vmul.f32 %v1629_v20, %v660_v16  ;;  %v667_v24 = vmul.f32 %v1627_v15, %v666_v21  ;;  %vm679_vm14 = vweird.f32 %v1629_v20 }
 0x26f   :  { %vm680_vm1 = vmor %vm678_vm0, %vm679_vm14 }
 0x270   :  { %v674_v23 = vmul.f32 %v1629_v20, %v673_v22  ;;  %v671_v27 = vsel %vm670_vm15, %v1627_v15, %v667_v24 }
 0x271   :  { %v682_v30 = vmul.f32 %v671_v27, %v2003_v31  ;;  %v1592_v31 = vld [vmem:[#allocation13 + $0x8] sm:$0xff] }
 0x272   :  { %v675_v25 = vmul.f32 0.5, %v674_v23  ;;  %1081 = vmatpush.bf16.msra.mxu3 %v1592_v31 }
 0x274   :  { %v676_v26 = vsub.f32 1.5, %v675_v25 }
 0x276   :  { %v677_v28 = vmul.f32 %v1629_v20, %v676_v26  ;;  %1082 = vmatpush.bf16.msra.mxu3 %v1591_v42 }
 0x278   :  { %v681_v29 = vsel %vm680_vm1, %v1629_v20, %v677_v28 }
 0x279   :  { %v683_v32 = vmul.f32 %v681_v29, %v2007_v34  ;;  %v1599_v34 = vld [vmem:[#allocation13 + $0x40] sm:$0xff] }
 0x27a   :  { %1096 = vmatpush.bf16.msrb.mxu0 %v1599_v34 }
 0x27b   :  { %v684_v33 = vpack.c.bf16 %v683_v32, %v682_v30 }
 0x27d   :  { %885 = vmatmul.bf16.vlgmr.msrb.gmra.mxu3 %v684_v33  ;;  %899 = vmatmul.bf16.vlgmr.msra.gmra.mxu0 %v684_v33 }
 0x27e   :  { %913 = vmatmul.bf16.vlgmr.msra.gmra.mxu1 %v684_v33  ;;  %927 = vmatmul.bf16.vlgmr.msra.gmra.mxu2 %v684_v33 }
 0x2fa   :  { %v900_v43 = vpop.f32.mrf.mxu0 }
 0x2fb   :  { %v914_v44 = vpop.f32.mrf.mxu1  ;;  %v934_v49 = vmax.f32 %v900_v43, 0.0 }
 0x300   :  { %v886_v45 = vpop.f32.mrf.mxu3 }
 0x301   :  { %v928_v46 = vpop.f32.mrf.mxu2  ;;  %v933_v48 = vmax.f32 %v886_v45, 0.0 }
 0x302   :  { %v902_v47 = vpop.f32.mrf.mxu0  ;;  %v938_v54 = vmul.f32 %v934_v49, %v928_v46 }
 0x303   :  { %v936_v50 = vmax.f32 %v902_v47, 0.0  ;;  %v916_v55 = vpop.f32.mrf.mxu1  ;;  %v937_v57 = vmul.f32 %v933_v48, %v914_v44 }
 0x308   :  { %v888_v51 = vpop.f32.mrf.mxu3 }
 0x309   :  { %v935_v52 = vmax.f32 %v888_v51, 0.0  ;;  %v930_v53 = vpop.f32.mrf.mxu2 }
 0x30a   :  { %v940_v56 = vmul.f32 %v936_v50, %v930_v53 }
 0x30b   :  { %v939_v58 = vmul.f32 %v935_v52, %v916_v55 }
 0x30c   :  { %v942_v59 = vpack.c.bf16 %v940_v56, %v938_v54 }
 0x30d   :  { %v941_v60 = vpack.c.bf16 %v939_v58, %v937_v57 }
 0x30e   :  { %1097 = vmatmul.bf16.vlgmr.msrb.gmra.mxu0 %v942_v59 }
 0x30f   :  { %1083 = vmatmul.bf16.vlgmr.msra.gmra.mxu3 %v941_v60 }
 0x38b   :  { %v1098_v62 = vpop.f32.mrf.mxu0 }
 0x392   :  { %v1084_v63 = vpop.f32.mrf.mxu3 }
 0x393   :  { %v1085_v0 = vadd.f32 %v1624_v61, %v1084_v63  ;;  %v1100_v6 = vpop.f32.mrf.mxu0 }
 0x395   :  { %v1099_v2 = vadd.f32 %v1098_v62, %v1085_v0 }
 0x397   :  { %v1107_v3 = vmul.f32 %v1625_v1, %v1099_v2 }
 0x399   :  { %1109 = vst [vmem:[#allocation15] sm:$0xff] %v1107_v3 }
 0x39a   :  { %v1086_v4 = vpop.f32.mrf.mxu3 }
 0x39b   :  { %v1087_v5 = vadd.f32 %v1624_v61, %v1086_v4 }
 0x39d   :  { %v1101_v7 = vadd.f32 %v1100_v6, %v1087_v5 }
 0x39f   :  { %v1108_v8 = vmul.f32 %v1625_v1, %v1101_v7 }
 0x3a1   :  { %1110 = vst [vmem:[#allocation15 + $0x8] sm:$0xff] %v1108_v8 }
 0x3a2   :  { %1136 = dma.vmem_to_hbm [thread:$0]  %s1129_s20, 256, %s1131_s23, [#allocation16], %s1867_s28, %s1867_s28, %s1868_s29  }
 0x3a3   :  { %1854 = dma.done.wait [#allocation4], 256  }
 0x3a4   :  { %1855 = vsyncadd [#allocation4], 4294967040 }
 0x3a5   :  { %1856 = dma.done.wait [#allocation16], 256  }
 0x3a6   :  { %1857 = vsyncadd [#allocation16], 4294967040 }
 0x3a7   :  { %1145 = vsyncpa [#allocation3], 1 }
 0x3a8   :  { %1146 = vsyncpa [#allocation6], 1 }
 0x3a9   :  { %1147 = vsyncpa [#allocation9], 1 }
 0x3aa   :  { %1148 = vsyncpa [#allocation12], 1 }
 0x3ab   :  { %1149 = vsyncpa [#allocation4], 1 }
 0x3ac   :  { %1150 = vsyncpa [#allocation16], 1 }

</bundles_post_ra>
